<compile_context>
chip_gen: v5e
topology: v5e:2x2
jax: 0.10.0
libtpu: 0.0.40
codegen_flags: <defaults>
</compile_context>

<pallas_src>
import math

import jax
import jax.numpy as jnp
from jax.experimental import pallas as pl
from jax.experimental.pallas import tpu as pltpu


def _round_up(x, m):
    return ((x + m - 1) // m) * m


def _pick_tile(dim, max_tile):
    """Largest 128-multiple <= max_tile that divides round_up(dim, 128)."""
    padded = _round_up(dim, 128)
    best = 128
    t = 128
    while t <= min(max_tile, padded):
        if padded % t == 0:
            best = t
        t += 128
    return best, padded


def _plan_tiles(batch, in_f, out_f):
    tk, in_p = _pick_tile(in_f, 1024)
    tn, out_p = _pick_tile(out_f, 512)
    tm = min(512, _round_up(max(batch, 1), 8))
    b_p = _round_up(max(batch, 1), tm)
    # v7x has 2 TensorCores which shard only the 'parallel' grid axes: keep at
    # least 2 iterations on (i, j) when the layer is big enough (split N first).
    if (b_p // tm) * (out_p // tn) < 2 and out_p // 128 >= 2:
        tn, out_p = _pick_tile(out_f, out_p // 2)
    return tm, tk, tn, b_p, in_p, out_p


def _noisy_linear_kernel(x_ref, w_ref, bias_ref, o_ref):
    """Grid = (b_p/tm, out_p/tn, k_total/tk); K (reduction) axis last.

    x_ref    : (tm, tk) bf16  rows of [x | x*eps_i]          (K-concatenated)
    w_ref    : (tk, tn) bf16  rows of [Wmu^T ; (Wsig*eps_j)^T]
    bias_ref : (8, tn)  f32   row 0 = bias_mu + bias_sigma*eps_j
    o_ref    : (tm, tn) f32   resident across K -> used directly as accumulator
    """
    k = pl.program_id(2)

    @pl.when(k == 0)
    def _():
        # Seed the resident output block with the (broadcast) noisy bias.
        o_ref[...] = jnp.zeros_like(o_ref) + bias_ref[0:1, :]

    o_ref[...] += jnp.dot(x_ref[...], w_ref[...],
                          preferred_element_type=jnp.float32)


def pack_noisy_linear(weight_mu, weight_sigma, bias_mu, bias_sigma,
                      eps_i, eps_j, *, batch_hint=128,
                      compute_dtype=jnp.bfloat16):
    """One-time (per reset_noise) weight prep.

    Produces the padded, transposed, eps_j-scaled, bf16 weight stack and the
    fused bias slab so the per-call forward only touches activation bytes.
    """
    out_f, in_f = weight_mu.shape
    _, tk, tn, _, in_p, out_p = _plan_tiles(batch_hint, in_f, out_f)
    k_total = 2 * in_p

    w_cat = jnp.zeros((k_total, out_p), compute_dtype)
    w_cat = w_cat.at[:in_f, :out_f].set(weight_mu.T.astype(compute_dtype))
    w_cat = w_cat.at[in_p:in_p + in_f, :out_f].set(
        (weight_sigma * eps_j[:, None]).T.astype(compute_dtype))

    bias = (bias_mu + bias_sigma * eps_j).astype(jnp.float32)
    bias_slab = jnp.zeros((8, out_p), jnp.float32).at[0, :out_f].set(bias)

    return dict(w_cat=w_cat, bias_slab=bias_slab,
                eps_i=eps_i.astype(jnp.float32),
                in_f=in_f, out_f=out_f, in_p=in_p, out_p=out_p,
                tk=tk, tn=tn, compute_dtype=compute_dtype)


def noisy_linear_forward(x, packed):
    """Training-mode NoisyLinear forward using pre-packed noisy weights."""
    B, in_f = x.shape
    assert in_f == packed["in_f"], "input feature mismatch"
    in_p, out_p = packed["in_p"], packed["out_p"]
    out_f = packed["out_f"]
    tk, tn = packed["tk"], packed["tn"]
    cdt = packed["compute_dtype"]
    k_total = 2 * in_p

    tm = min(512, _round_up(B, 8))
    b_p = _round_up(B, tm)

    # Per-call activation prep only: pad, apply eps_i, cast — O(B * in) bytes.
    x32 = x.astype(jnp.float32)
    x_cat = jnp.zeros((b_p, k_total), cdt)
    x_cat = x_cat.at[:B, :in_f].set(x32.astype(cdt))
    x_cat = x_cat.at[:B, in_p:in_p + in_f].set(
        (x32 * packed["eps_i"]).astype(cdt))

    grid = (b_p // tm, out_p // tn, k_total // tk)

    # Explicit VMEM budget: double-buffered x/w/bias tiles + resident f32 output.
    itemsize = jnp.dtype(cdt).itemsize
    vmem_bytes = (2 * (tm * tk + tk * tn) * itemsize
                  + 2 * 8 * tn * 4 + 2 * tm * tn * 4)
    vmem_limit = int(min(100 * 2**20, max(32 * 2**20, 2 * vmem_bytes)))

    y_p = pl.pallas_call(
        _noisy_linear_kernel,
        out_shape=jax.ShapeDtypeStruct((b_p, out_p), jnp.float32),
        grid_spec=pltpu.PrefetchScalarGridSpec(
            num_scalar_prefetch=0,
            grid=grid,
            in_specs=[
                pl.BlockSpec((tm, tk), lambda i, j, k: (i, k)),   # [x | x*eps_i]
                pl.BlockSpec((tk, tn), lambda i, j, k: (k, j)),   # [Wmu^T ; (Wsig*eps_j)^T]
                pl.BlockSpec((8, tn), lambda i, j, k: (0, j)),    # fused bias slab
            ],
            out_specs=pl.BlockSpec((tm, tn), lambda i, j, k: (i, j)),
        ),
        compiler_params=pltpu.CompilerParams(
            dimension_semantics=("parallel", "parallel", "arbitrary"),
            vmem_limit_bytes=vmem_limit),
    )(x_cat, packed["w_cat"], packed["bias_slab"])

    return y_p[:B, :out_f].astype(x.dtype)


def scale_noise(key, size):
    # reset_noise() helper: sign(z) * sqrt(|z|), z ~ N(0, 1).
    z = jax.random.normal(key, (size,), dtype=jnp.float32)
    return jnp.sign(z) * jnp.sqrt(jnp.abs(z))


def init_noisy_linear_params(key, in_features, out_features, sigma_init=0.5):
    k1, k2 = jax.random.split(key)
    mu_range = 1.0 / math.sqrt(in_features)
    weight_mu = jax.random.uniform(k1, (out_features, in_features),
                                   minval=-mu_range, maxval=mu_range,
                                   dtype=jnp.float32)
    bias_mu = jax.random.uniform(k2, (out_features,),
                                 minval=-mu_range, maxval=mu_range,
                                 dtype=jnp.float32)
    weight_sigma = jnp.full((out_features, in_features),
                            sigma_init / math.sqrt(in_features), jnp.float32)
    bias_sigma = jnp.full((out_features,),
                          sigma_init / math.sqrt(out_features), jnp.float32)
    return weight_mu, weight_sigma, bias_mu, bias_sigma


if __name__ == "__main__":
    B, IN_F, OUT_F = 8, 32, 64

    root = jax.random.PRNGKey(0)
    k_param, k_x, k_ei, k_ej = jax.random.split(root, 4)

    weight_mu, weight_sigma, bias_mu, bias_sigma = init_noisy_linear_params(
        k_param, IN_F, OUT_F, sigma_init=0.5)

    # reset_noise(): factorized Gaussian noise (plain JAX, buffer setup).
    eps_i = scale_noise(k_ei, IN_F)
    eps_j = scale_noise(k_ej, OUT_F)

    x = jax.random.normal(k_x, (B, IN_F), dtype=jnp.float32)

    # One-time pack (per reset_noise), then the cheap per-call forward.
    packed = pack_noisy_linear(weight_mu, weight_sigma, bias_mu, bias_sigma,
                               eps_i, eps_j, batch_hint=B)
    y = noisy_linear_forward(x, packed)
    jax.block_until_ready(y)
    assert y.shape == (B, OUT_F)

    bias = bias_mu + bias_sigma * eps_j

    # Tight check: same bf16-streamed operands / f32 accumulation / rank-1 math
    # as the kernel, in plain JAX.
    y_match = (
        jnp.dot(x.astype(jnp.bfloat16), weight_mu.T.astype(jnp.bfloat16),
                preferred_element_type=jnp.float32)
        + jnp.dot((x * eps_i).astype(jnp.bfloat16),
                  (weight_sigma * eps_j[:, None]).T.astype(jnp.bfloat16),
                  preferred_element_type=jnp.float32)
        + bias)
    assert jnp.allclose(y, y_match, atol=1e-4, rtol=1e-4), (
        f"max abs err vs matched bf16 reference: {jnp.max(jnp.abs(y - y_match))}")

    # Loose check: full-precision math of the original PyTorch training forward
    # (bf16 streaming introduces ~1e-3 relative rounding).
    weight = weight_mu + weight_sigma * jnp.outer(eps_j, eps_i)
    y_f32 = x @ weight.T + bias
    assert jnp.allclose(y, y_f32, atol=8e-2, rtol=5e-2), (
        f"max abs err vs f32 reference: {jnp.max(jnp.abs(y - y_f32))}")

    print("KERNEL_OK")
</pallas_src>

<mosaic_0001>
module attributes {stable_mosaic.version = 11 : i64} {
  func.func @_noisy_linear_kernel(%arg0: i32, %arg1: i32, %arg2: i32, %arg3: memref<8x128xbf16, #tpu.memory_space<vmem>>, %arg4: memref<128x128xbf16, #tpu.memory_space<vmem>>, %arg5: memref<8x128xf32, #tpu.memory_space<vmem>>, %arg6: memref<8x128xf32, #tpu.memory_space<vmem>>) attributes {dimension_semantics = [#tpu.dimension_semantics<parallel>, #tpu.dimension_semantics<parallel>, #tpu.dimension_semantics<arbitrary>], iteration_bounds = array<i64: 1, 1, 2>, scalar_prefetch = 0 : i64, scratch_operands = 0 : i64, tpu.core_type = #tpu.core_type<tc>, window_params = [{transform_indices = @transform_0, window_bounds = array<i64: 8, 128>}, {transform_indices = @transform_1, window_bounds = array<i64: 128, 128>}, {transform_indices = @transform_2, window_bounds = array<i64: 8, 128>}, {transform_indices = @transform_3, window_bounds = array<i64: 8, 128>}]} {
    %c0_i32 = arith.constant 0 : i32
    %0 = arith.cmpi eq, %arg2, %c0_i32 : i32
    %1 = arith.extui %0 : i1 to i32
    %c0_i32_0 = arith.constant 0 : i32
    %2 = arith.cmpi ne, %1, %c0_i32_0 : i32
    scf.if %2 {
      %cst_8 = arith.constant 0.000000e+00 : f32
      %9 = vector.broadcast %cst_8 : f32 to vector<8x128xf32>
      %c0_9 = arith.constant 0 : index
      %c0_10 = arith.constant 0 : index
      %10 = vector.load %arg5[%c0_9, %c0_10] : memref<8x128xf32, #tpu.memory_space<vmem>>, vector<1x128xf32>
      %11 = vector.broadcast %10 : vector<1x128xf32> to vector<8x128xf32>
      %12 = arith.addf %9, %11 : vector<8x128xf32>
      %c0_11 = arith.constant 0 : index
      %c0_12 = arith.constant 0 : index
      %13 = vector.load %arg6[%c0_11, %c0_12] : memref<8x128xf32, #tpu.memory_space<vmem>>, vector<8x128xf32>
      tpu.vector_store %arg6[%c0_11, %c0_12], %12 {strides = array<i32>} : memref<8x128xf32, #tpu.memory_space<vmem>>, vector<8x128xf32>,
    } else {
    }
    %c0 = arith.constant 0 : index
    %c0_1 = arith.constant 0 : index
    %3 = vector.load %arg6[%c0, %c0_1] : memref<8x128xf32, #tpu.memory_space<vmem>>, vector<8x128xf32>
    %c0_2 = arith.constant 0 : index
    %c0_3 = arith.constant 0 : index
    %4 = vector.load %arg3[%c0_2, %c0_3] : memref<8x128xbf16, #tpu.memory_space<vmem>>, vector<8x128xbf16>
    %c0_4 = arith.constant 0 : index
    %c0_5 = arith.constant 0 : index
    %5 = vector.load %arg4[%c0_4, %c0_5] : memref<128x128xbf16, #tpu.memory_space<vmem>>, vector<128x128xbf16>
    %cst = arith.constant dense<0.000000e+00> : vector<8x128xf32>
    %6 = tpu.matmul %4, %5, %cst {dimension_numbers = #tpu.dot_dimension_numbers<[1], [0], [0], [1], [0, 0, 1, 1], [], []>} : vector<8x128xbf16>, vector<128x128xbf16>, vector<8x128xf32> -> vector<8x128xf32>
    %7 = arith.addf %3, %6 : vector<8x128xf32>
    %c0_6 = arith.constant 0 : index
    %c0_7 = arith.constant 0 : index
    %8 = vector.load %arg6[%c0_6, %c0_7] : memref<8x128xf32, #tpu.memory_space<vmem>>, vector<8x128xf32>
    tpu.vector_store %arg6[%c0_6, %c0_7], %7 {strides = array<i32>} : memref<8x128xf32, #tpu.memory_space<vmem>>, vector<8x128xf32>,
    return
  }
  func.func @transform_0(%arg0: i32, %arg1: i32, %arg2: i32) -> (i32, i32) {
    %c0_i32 = arith.constant 0 : i32
    return %arg0, %arg2 : i32, i32
  }
  func.func @transform_1(%arg0: i32, %arg1: i32, %arg2: i32) -> (i32, i32) {
    %c0_i32 = arith.constant 0 : i32
    return %arg2, %arg1 : i32, i32
  }
  func.func @transform_2(%arg0: i32, %arg1: i32, %arg2: i32) -> (i32, i32) {
    %c0_i32 = arith.constant 0 : i32
    %c0_i32_0 = arith.constant 0 : i32
    return %c0_i32, %arg1 : i32, i32
  }
  func.func @transform_3(%arg0: i32, %arg1: i32, %arg2: i32) -> (i32, i32) {
    %c0_i32 = arith.constant 0 : i32
    return %arg0, %arg1 : i32, i32
  }
}

</mosaic_0001>

<bundles_post_ra>
// kernel: tpu_custom_call.1
= control target key start
LH: loop header
LB: loop body
LE: loop exit
PB: predicated region body
PF: predicated region fallthrough
CT: control target
= control target key end

     0   :  { %8 = vsyncpa [#allocation3], 0  ;;  %s956_s0 = inlined_call_operand.hbm [shape: bf16[8,256], index: 0, kind: input, shape index: {}]   ;;  %s957_s1 = inlined_call_operand.hbm [shape: bf16[256,128], index: 1, kind: input, shape index: {}]   ;;  %s958_s2 = inlined_call_operand.hbm [shape: f32[8,128], index: 2, kind: input, shape index: {}]   ;;  %s959_s3 = inlined_call_operand.hbm [shape: f32[8,128], index: 3, kind: output, shape index: {}]  }
   0x1   :  { %10 = vsyncpa [#allocation3 + $0x1], 0 }
   0x2   :  { %11 = vsyncpa [#allocation6], 0 }
   0x3   :  { %13 = vsyncpa [#allocation6 + $0x1], 0 }
   0x4   :  { %14 = vsyncpa [#allocation4], 0  ;;  %s823_s12 = smov 0   ;;  %s825_s13 = smov 0  }
   0x5   :  { %s827_s14 = smov 0   ;;  %s829_s15 = smov 0  }
   0x6   :  { %s831_s16 = smov 0   ;;  %s833_s17 = smov 0  }
   0x7 LB: > { %s852_s18 = sadd.s32 4294967295, %s797_s17   ;;  %p61_p0 = scmp.ne.s32.totalorder %s781_s13, %s777_s12  ;;  %s797_s17 = sphi %s833_s17, %s20_s17   ;;  %s793_s16 = sphi %s831_s16, %s968_s16   ;;  %s789_s15 = sphi %s829_s15, %s967_s15   ;;  %s785_s14 = sphi %s827_s14, %s966_s14   ;;  %s781_s13 = sphi %s825_s13, %s965_s13   ;;  %s777_s12 = sphi %s823_s12, %s964_s12  }
   0x8   : > { %p62_p1 = scmp.eq.s32.totalorder %s852_s18, 0  ;;  %p478_p2 = scmp.ge.s32.totalorder %s797_s17, 1 }
   0x9   : > { %p154_p3 = scmp.lt.s32.totalorder %s797_s17, 3  ;;  %s168_s22 = sshll.u32 %s958_s2, 4  ;;  %s169_s22 = int_to_ptr.hbm [resolvable:$true] %s168_s22 }
   0xa   : > { %p860_p4 = por %p62_p1, %p61_p0  ;;  %s799_s24 = smov [#allocation7]  }
   0xb   : > { %p867_p5 = pnand %p478_p2, %p154_p3  ;;  %s170_s25 = sshll.u32 %s799_s24, 4  ;;  %s171_s25 = int_to_ptr.vmem [resolvable:$true] %s170_s25 }
   0xc   : > { %s32_s26 = sadd.s32 1, %s793_s16  ;;  %s48_s27 = sadd.s32 1, %s785_s14 }
   0xd   : > { %p548_p6 = pneg %p867_p5  ;;  %p33_p8 = scmp.ge.s32.totalorder %s32_s26, 2 }
   0xe   : > { %p55_p9 = scmp.ne.s32.totalorder %s785_s14, %s781_s13  ;;  %p56_p10 = scmp.eq.s32.totalorder %s797_s17, 0 }
   0xf   : > { %p549_p7 = pnand %p548_p6, %p62_p1  ;;  %s970_s26 = smov (%p33_p8, %s32_s26), 0 }
  0x10   : > { %p882_p11 = por %p56_p10, %p55_p9  ;;  %p560_p12 = scmp.lt.s32.totalorder %s797_s17, 2 }
  0x11   : > { %551 = dma.hbm_to_vmem [thread:$0]  (!%p549_p7), %s169_s22, 128, %s171_s25, [#allocation6]  }
  0x12   : > { %s44_s29 = ssub.s32 %s793_s16, %s970_s26  ;;  %s181_s30 = sand.u32 1, %s785_s14  }
  0x13   : > { %p46_p13 = scmp.eq.s32.totalorder %s44_s29, 0  ;;  %s481_s4 = sshll.u32 %s181_s30, 2 }
  0x14   : > { %s482_s5 = sshll.u32 %s793_s16, 2  ;;  %s185_s11 = scalar_lea.vmem [#allocation2], %s481_s4 }
  0x15   : > { %s892_s6 = scalar_select %p46_p13, %s785_s14, %s48_s27  }
  0x16   : > { %s191_s9 = scalar_lea.hbm %s956_s0, %s482_s5  ;;  %s195_s12 = sshll.u32 %s185_s11, 4  ;;  %s196_s12 = int_to_ptr.vmem [resolvable:$true] %s195_s12 }
  0x17   : > { %s193_s10 = sshll.u32 %s191_s9, 4  ;;  %p901_p0 = pnand %p560_p12, %p882_p11  ;;  %s194_s10 = int_to_ptr.hbm [resolvable:$true] %s193_s10 }
  0x18   : > { %s483_s21 = sshll.u32 %s181_s30, 6  ;;  %s527_s22 = sshll.u32 %s793_s16, 6 }
  0x19   : > { %s206_s24 = scalar_lea.vmem [#allocation5], %s483_s21  ;;  %s182_s27 = scalar_lea.sflag [#allocation3], %s181_s30 }
  0x1a   : > { %s215_s25 = sshll.u32 %s206_s24, 4  ;;  %s202_s29 = sand.u32 1, %s797_s17   ;;  %s216_s25 = int_to_ptr.vmem [resolvable:$true] %s215_s25 }
  0x1b   : > { %555 = dma.hbm_to_vmem [thread:$0]  (!%p901_p0), %s194_s10, 64, %s196_s12, %s182_s27  }
  0x1c   : > { %s212_s28 = scalar_lea.hbm %s957_s1, %s527_s22  ;;  %s203_s8 = scalar_lea.sflag [#allocation6], %s202_s29 }
  0x1d   : > { %s213_s7 = sshll.u32 %s212_s28, 4  ;;  %s800_s9 = smov 64   ;;  %s214_s7 = int_to_ptr.hbm [resolvable:$true] %s213_s7 }
  0x1e   : > { %s801_s11 = smov 4   ;;  %227 = sbr.rel (%p867_p5) target bundleno = 218 (0xda), region = 32 }
  0x1f   : > { %558 = dma.hbm_to_vmem [thread:$0]  (!%p901_p0), %s214_s7, 1024, %s216_s25, %s203_s8, %s800_s9, %s800_s9, %s801_s11  }
  0x20   : > { %s229_s30 = sand.u32 (!%p867_p5), 1, %s781_s13  }
  0x21   : > { %s487_s10 = sshll.u32 (!%p867_p5), %s229_s30, 2  ;;  %s230_s12 = scalar_lea.sflag (!%p867_p5), [#allocation3], %s229_s30 }
  0x22   : > { %s917_s21 = scalar_lea.vmem (!%p867_p5), [#allocation2], %s487_s10 }
  0x23   : > { %760 = dma.done.wait (%p860_p4), %s230_s12, 64  }
  0x24   : > { %762 = vsyncadd (%p860_p4), %s230_s12, 4294967232  ;;  %s239_s22 = sand.u32 1, %s852_s18   ;;  %s488_s20 = sshll.u32 %s229_s30, 6 }
  0x25   : > { %s240_s24 = scalar_lea.sflag [#allocation6], %s239_s22  ;;  %s243_s25 = scalar_lea.vmem [#allocation5], %s488_s20 }
  0x26   : > { %764 = dma.done.wait (%p860_p4), %s240_s24, 1024  }
  0x27   : > { %766 = vsyncadd (%p860_p4), %s240_s24, 4294966272 }
  0x28   : > { %768 = dma.done.wait (%p62_p1), [#allocation6], 128  }
  0x29   : > { %770 = vsyncadd (%p62_p1), [#allocation6], 4294967168  ;;  %p490_p2 = scmp.ne.s32.totalorder %s789_s15, 0 }
  0x2b   : > { %276 = sbr.rel (%p490_p2) target bundleno = 50 (0x32), region = 48 }
  0x30   : > { %v616_v0 = vld [vmem:[#allocation7] ss:$0 sm:$0xff] }
  0x31   : > { %280 = vst [vmem:[#allocation8] sm:$0xff] %v616_v0 }
  0x32 PF: > { %v535_v1 = vld [vmem:[%s243_s25 + $0x38] sm:$0xff]  ;;  %v534_v2 = vld [vmem:[%s243_s25 + $0x30] sm:$0xff]  ;;  %v533_v3 = vld [vmem:[%s243_s25 + $0x28] sm:$0xff]  ;;  %s802_s15 = smov [#allocation8]   ;;  %s373_s29 = sshll.u32 %s959_s3, 4  ;;  %s374_s29 = int_to_ptr.hbm [resolvable:$true] %s373_s29 }
  0x33   : > { %347 = vmatpush.bf16.msra.mxu0 %v535_v1  ;;  %v532_v4 = vld [vmem:[%s243_s25 + $0x20] sm:$0xff]  ;;  %v531_v5 = vld [vmem:[%s243_s25 + $0x18] sm:$0xff]  ;;  %v530_v6 = vld [vmem:[%s243_s25 + $0x10] sm:$0xff]  ;;  %s371_s19 = sshll.u32 %s802_s15, 4  ;;  %p562_p1 = scmp.eq.s32.totalorder %s852_s18, 1  ;;  %s372_s19 = int_to_ptr.vmem [resolvable:$true] %s371_s19 }
  0x34   : > { %v529_v7 = vld [vmem:[%s243_s25 + $0x8] sm:$0xff]  ;;  %v528_v8 = vld [vmem:[%s243_s25] sm:$0xff]  ;;  %v282_v9 = vld [vmem:[%s917_s21] sm:$0xf] }
  0x37   : > { %348 = vmatpush.bf16.msra.mxu0 %v534_v2 }
  0x38   : > { %v281_v10 = vld [vmem:[#allocation8] sm:$0xff] }
  0x3b   : > { %349 = vmatpush.bf16.msra.mxu0 %v533_v3 }
  0x3f   : > { %350 = vmatpush.bf16.msra.mxu0 %v532_v4 }
  0x43   : > { %351 = vmatpush.bf16.msra.mxu0 %v531_v5 }
  0x47   : > { %352 = vmatpush.bf16.msra.mxu0 %v530_v6 }
  0x4b   : > { %353 = vmatpush.bf16.msra.mxu0 %v529_v7 }
  0x4f   : > { %354 = vmatpush.bf16.msra.mxu0 %v528_v8 }
  0x52   : > { %355 = vmatmul.bf16.vlgmr.msra.gmra.mxu0 %v282_v9 }
  0xcf   : > { %v356_v11 = vpop.f32.mrf.mxu0 }
  0xd0   : > { %v360_v12 = vadd.f32 %v356_v11, %v281_v10 }
  0xd2   : > { %361 = vst [vmem:[#allocation8] sm:$0xff] %v360_v12 }
  0xd3   : > { %545 = dma.vmem_to_hbm [thread:$0]  (%p562_p1), %s372_s19, 128, %s374_s29, [#allocation4]  }
  0xd7   : > { %v358_v13 = vpop.f32.mrf.mxu0 }
  0xd8   : > { %772 = dma.done.wait (%p562_p1), [#allocation4], 128  }
  0xd9   : > { %774 = vsyncadd (%p562_p1), [#allocation4], 4294967168 }
  0xda PF: > { %s20_s17 = sadd.s32 1, %s797_s17   ;;  %s964_s12 = smov %s781_s13 }
  0xdb   : > { %p17_p3 = scmp.ge.s32.totalorder %s20_s17, 4   ;;  %s965_s13 = smov %s785_s14 }
  0xdc   : > { %s966_s14 = smov %s892_s6  ;;  %s967_s15 = smov %s793_s16 }
  0xdd   : > { %s968_s16 = smov %s970_s26  ;;  %19 = sbr.rel (!%p17_p3) target bundleno = 7 (0x7), region = 92 }
  0xe2   :  { %387 = vsyncpa [#allocation3], 1 }
  0xe3   :  { %389 = vsyncpa [#allocation3 + $0x1], 1 }
  0xe4   :  { %390 = vsyncpa [#allocation6], 1 }
  0xe5   :  { %392 = vsyncpa [#allocation6 + $0x1], 1 }
  0xe6   :  { %393 = vsyncpa [#allocation4], 1 }
  0xe7   :  { %395 = vsyncpa [#allocation4 + $0x1], 1 }

</bundles_post_ra>
